<compile_context>
chip_gen: v7x
topology: tpu7x:2x2x1
jax: 0.10.0
libtpu: 0.0.40
codegen_flags: <defaults>
</compile_context>

<pallas_src>
import functools

import jax
import jax.numpy as jnp
from jax.experimental import pallas as pl
from jax.experimental.pallas import tpu as pltpu

K = 7          # conv kernel size
PAD = 3        # conv padding


def _spatial_attn_kernel(x_ref, g_ref, bands_ref, o_ref, *, C, H, W, NB):
    # x_ref:     (NB, C, H, W)   VMEM
    # g_ref:     (NB, 1, H, W)   VMEM   (resized guiding map, pre-sigmoid)
    # bands_ref: (2*K*W, W)      VMEM   bf16 fused banded conv matrix (resident)
    # o_ref:     (NB, 1, H, W)   VMEM

    # ---- streamed channel mean / max (two (NB,H,W) f32 accumulators) ------
    x0 = x_ref[:, 0].astype(jnp.float32)
    if C <= 8:
        sum_acc, max_acc = x0, x0
        for c in range(1, C):
            xc = x_ref[:, c].astype(jnp.float32)
            sum_acc = sum_acc + xc
            max_acc = jnp.maximum(max_acc, xc)
    else:
        def body(c, carry):
            s, m = carry
            xc = x_ref[:, c].astype(jnp.float32)
            return s + xc, jnp.maximum(m, xc)
        sum_acc, max_acc = jax.lax.fori_loop(1, C, body, (x0, x0), unroll=4)
    avg_out = sum_acc * (1.0 / C)

    guide = jax.nn.sigmoid(g_ref[:, 0].astype(jnp.float32))      # (NB, H, W)
    feats = (avg_out * guide, max_acc * guide)                   # c = 0 avg, 1 max

    # ---- fused LHS: 14 H-shifted (zero-halo) copies, lane-concatenated ----
    zero_rows = [None] + [jnp.zeros((NB, d, W), jnp.float32)
                          for d in range(1, PAD + 1)]
    cols = []
    for f in feats:
        for kh in range(K):
            sh = kh - PAD                      # source row = h + sh
            if sh == 0:
                piece = f
            elif sh > 0:
                piece = jnp.concatenate([f[:, sh:, :], zero_rows[sh]], axis=1)
            else:
                piece = jnp.concatenate([zero_rows[-sh], f[:, :H + sh, :]],
                                        axis=1)
            cols.append(piece)
    lhs = jnp.concatenate(cols, axis=-1)                         # (NB, H, 2*K*W)
    lhs = lhs.astype(jnp.bfloat16).reshape(NB * H, 2 * K * W)

    # ---- one deep MXU contraction (depth 2*K*W), f32 accumulation ----------
    out = jnp.dot(lhs, bands_ref[...], preferred_element_type=jnp.float32)
    o_ref[...] = jax.nn.sigmoid(out).reshape(NB, 1, H, W).astype(o_ref.dtype)


def _interp_matrix(out_size, in_size):
    """Row-interpolation matrix A (out_size, in_size), align_corners=True."""
    if out_size == in_size:
        return jnp.eye(out_size, dtype=jnp.float32)
    if out_size == 1:
        return jnp.zeros((1, in_size), jnp.float32).at[0, 0].set(1.0)
    scale = (in_size - 1) / (out_size - 1)
    s = jnp.arange(out_size, dtype=jnp.float32) * scale
    i0 = jnp.floor(s).astype(jnp.int32)
    i1 = jnp.minimum(i0 + 1, in_size - 1)
    t = s - i0.astype(jnp.float32)
    rows = jnp.arange(out_size)
    A = jnp.zeros((out_size, in_size), jnp.float32)
    A = A.at[rows, i0].add(1.0 - t)
    A = A.at[rows, i1].add(t)
    return A


def _bilinear_align_corners(g, out_h, out_w):
    """F.interpolate(..., mode='bilinear', align_corners=True) via 2 matmuls."""
    n, c, hg, wg = g.shape
    g = g.astype(jnp.float32)
    if out_h == hg and out_w == wg:
        return g
    Ay = _interp_matrix(out_h, hg)                      # (H, Hg)
    Ax = _interp_matrix(out_w, wg)                      # (W, Wg)
    return jnp.einsum("hy,ncyx,wx->nchw", Ay, g, Ax)


def _band_matrices(conv_w, W):
    """Fold kw into banded (W, W) matrices: B[c*K+kh][w_in, w_out] =
    conv_w[0, c, kh, w_in - w_out + PAD] (clipped band == 'same' W-padding),
    then fuse them into one (2*K*W, W) RHS for a single MXU contraction."""
    w = conv_w.astype(jnp.float32)[0]                   # (2, K, K)
    idx = jnp.arange(W)
    diff = idx[:, None] - idx[None, :] + PAD            # (W, W) kw index
    mask = ((diff >= 0) & (diff < K)).astype(jnp.float32)
    diffc = jnp.clip(diff, 0, K - 1)
    bands = w[:, :, diffc] * mask[None, None, :, :]     # (2, K, W, W)
    return bands.reshape(2 * K * W, W)


def my_spatial_attention(x, guiding_map0, conv_w, *, nb=None):
    """x: (N, C, H, W); guiding_map0: (N, 1, Hg, Wg); conv_w: (1, 2, 7, 7)."""
    N, C, H, W = x.shape
    g = _bilinear_align_corners(guiding_map0, H, W)       # (N, 1, H, W) f32
    bands = _band_matrices(conv_w, W).astype(jnp.bfloat16)  # (2*K*W, W) bf16

    if nb is None:
        nb = max(1, min(N, pl.cdiv(128, H)))     # fill ~128 MXU rows per step
        while nb > 1 and pl.cdiv(N, nb) < 2:     # keep >=2 grid steps (v7x)
            nb //= 2
    grid_n = pl.cdiv(N, nb)
    Np = grid_n * nb
    if Np != N:
        padn = Np - N
        x = jnp.pad(x, ((0, padn), (0, 0), (0, 0), (0, 0)))
        g = jnp.pad(g, ((0, padn), (0, 0), (0, 0), (0, 0)))

    kernel = functools.partial(_spatial_attn_kernel, C=C, H=H, W=W, NB=nb)

    out = pl.pallas_call(
        kernel,
        out_shape=jax.ShapeDtypeStruct((Np, 1, H, W), x.dtype),
        grid_spec=pltpu.PrefetchScalarGridSpec(
            num_scalar_prefetch=0,
            grid=(grid_n,),
            in_specs=[
                pl.BlockSpec((nb, C, H, W), lambda n: (n, 0, 0, 0)),
                pl.BlockSpec((nb, 1, H, W), lambda n: (n, 0, 0, 0)),
                pl.BlockSpec((2 * K * W, W), lambda n: (0, 0)),
            ],
            out_specs=pl.BlockSpec((nb, 1, H, W), lambda n: (n, 0, 0, 0)),
        ),
        compiler_params=pltpu.CompilerParams(
            dimension_semantics=("parallel",)),
    )(x, g, bands)
    return out[:N]


def _reference(x, guiding_map0, conv_w):
    """Pure-JAX reference of the PyTorch forward pass (for sanity check)."""
    N, C, H, W = x.shape
    g = jax.nn.sigmoid(_bilinear_align_corners(guiding_map0, H, W))
    avg_out = jnp.mean(x, axis=1, keepdims=True)
    max_out = jnp.max(x, axis=1, keepdims=True)
    feat = jnp.concatenate([avg_out * g, max_out * g], axis=1)   # (N,2,H,W)
    out = jax.lax.conv_general_dilated(
        feat, conv_w, window_strides=(1, 1),
        padding=[(PAD, PAD), (PAD, PAD)],
        dimension_numbers=("NCHW", "OIHW", "NCHW"),
        precision=jax.lax.Precision.HIGHEST)
    return jax.nn.sigmoid(out)


if __name__ == "__main__":
    key = jax.random.PRNGKey(0)
    kx, kg, kw = jax.random.split(key, 3)

    N, C, H, W = 2, 4, 16, 16
    Hg, Wg = 8, 8

    x = jax.random.normal(kx, (N, C, H, W), dtype=jnp.float32)
    guiding_map0 = jax.random.normal(kg, (N, 1, Hg, Wg), dtype=jnp.float32)
    # Deterministic Conv2d(2, 1, 7, bias=False) weight init (uniform bound).
    bound = 1.0 / (2 * K * K) ** 0.5
    conv_w = jax.random.uniform(kw, (1, 2, K, K), dtype=jnp.float32,
                                minval=-bound, maxval=bound)

    out = my_spatial_attention(x, guiding_map0, conv_w)
    out = jax.block_until_ready(out)

    ref = _reference(x, guiding_map0, conv_w)
    assert out.shape == (N, 1, H, W)
    assert jnp.allclose(out, ref, atol=2e-3, rtol=2e-3), "mismatch vs reference"

    print("KERNEL_OK")
</pallas_src>

<mosaic_0001>
module attributes {stable_mosaic.version = 11 : i64} {
  func.func @_spatial_attn_kernel(%arg0: i32, %arg1: memref<1x4x16x16xf32, #tpu.memory_space<vmem>>, %arg2: memref<1x1x16x16xf32, #tpu.memory_space<vmem>>, %arg3: memref<224x16xbf16, #tpu.memory_space<vmem>>, %arg4: memref<1x1x16x16xf32, #tpu.memory_space<vmem>>) attributes {dimension_semantics = [#tpu.dimension_semantics<parallel>], iteration_bounds = array<i64: 2>, scalar_prefetch = 0 : i64, scratch_operands = 0 : i64, tpu.core_type = #tpu.core_type<tc>, window_params = [{transform_indices = @transform_0, window_bounds = array<i64: 1, 4, 16, 16>}, {transform_indices = @transform_1, window_bounds = array<i64: 1, 1, 16, 16>}, {pipeline_mode = #tpu.pipeline_mode<synchronous>, transform_indices = @transform_2, window_bounds = array<i64: 224, 16>}, {transform_indices = @transform_3, window_bounds = array<i64: 1, 1, 16, 16>}]} {
    %c0 = arith.constant 0 : index
    %c0_0 = arith.constant 0 : index
    %c0_1 = arith.constant 0 : index
    %c0_2 = arith.constant 0 : index
    %0 = vector.load %arg1[%c0, %c0_0, %c0_1, %c0_2] : memref<1x4x16x16xf32, #tpu.memory_space<vmem>>, vector<1x1x16x16xf32>
    %1 = vector.shape_cast %0 : vector<1x1x16x16xf32> to vector<1x16x16xf32>
    %c0_3 = arith.constant 0 : index
    %c1 = arith.constant 1 : index
    %c0_4 = arith.constant 0 : index
    %c0_5 = arith.constant 0 : index
    %2 = vector.load %arg1[%c0_3, %c1, %c0_4, %c0_5] : memref<1x4x16x16xf32, #tpu.memory_space<vmem>>, vector<1x1x16x16xf32>
    %3 = vector.shape_cast %2 : vector<1x1x16x16xf32> to vector<1x16x16xf32>
    %4 = arith.addf %1, %3 : vector<1x16x16xf32>
    %5 = arith.maximumf %1, %3 : vector<1x16x16xf32>
    %c0_6 = arith.constant 0 : index
    %c2 = arith.constant 2 : index
    %c0_7 = arith.constant 0 : index
    %c0_8 = arith.constant 0 : index
    %6 = vector.load %arg1[%c0_6, %c2, %c0_7, %c0_8] : memref<1x4x16x16xf32, #tpu.memory_space<vmem>>, vector<1x1x16x16xf32>
    %7 = vector.shape_cast %6 : vector<1x1x16x16xf32> to vector<1x16x16xf32>
    %8 = arith.addf %4, %7 : vector<1x16x16xf32>
    %9 = arith.maximumf %5, %7 : vector<1x16x16xf32>
    %c0_9 = arith.constant 0 : index
    %c3 = arith.constant 3 : index
    %c0_10 = arith.constant 0 : index
    %c0_11 = arith.constant 0 : index
    %10 = vector.load %arg1[%c0_9, %c3, %c0_10, %c0_11] : memref<1x4x16x16xf32, #tpu.memory_space<vmem>>, vector<1x1x16x16xf32>
    %11 = vector.shape_cast %10 : vector<1x1x16x16xf32> to vector<1x16x16xf32>
    %12 = arith.addf %8, %11 : vector<1x16x16xf32>
    %13 = arith.maximumf %9, %11 : vector<1x16x16xf32>
    %cst = arith.constant 2.500000e-01 : f32
    %14 = vector.broadcast %cst : f32 to vector<1x16x16xf32>
    %15 = arith.mulf %12, %14 : vector<1x16x16xf32>
    %c0_12 = arith.constant 0 : index
    %c0_13 = arith.constant 0 : index
    %c0_14 = arith.constant 0 : index
    %c0_15 = arith.constant 0 : index
    %16 = vector.load %arg2[%c0_12, %c0_13, %c0_14, %c0_15] : memref<1x1x16x16xf32, #tpu.memory_space<vmem>>, vector<1x1x16x16xf32>
    %17 = vector.shape_cast %16 : vector<1x1x16x16xf32> to vector<1x16x16xf32>
    %18 = arith.negf %17 : vector<1x16x16xf32>
    %19 = math.exp %18 : vector<1x16x16xf32>
    %cst_16 = arith.constant 1.000000e+00 : f32
    %20 = vector.broadcast %cst_16 : f32 to vector<1x16x16xf32>
    %21 = arith.addf %20, %19 : vector<1x16x16xf32>
    %22 = arith.divf %20, %21 : vector<1x16x16xf32>
    %23 = arith.mulf %15, %22 : vector<1x16x16xf32>
    %24 = arith.mulf %13, %22 : vector<1x16x16xf32>
    %cst_17 = arith.constant 0.000000e+00 : f32
    %25 = vector.broadcast %cst_17 : f32 to vector<1x1x16xf32>
    %cst_18 = arith.constant 0.000000e+00 : f32
    %26 = vector.broadcast %cst_18 : f32 to vector<1x2x16xf32>
    %cst_19 = arith.constant 0.000000e+00 : f32
    %27 = vector.broadcast %cst_19 : f32 to vector<1x3x16xf32>
    %28 = vector.extract_strided_slice %23 {offsets = [0, 0, 0], sizes = [1, 13, 16], strides = [1, 1, 1]} : vector<1x16x16xf32> to vector<1x13x16xf32>
    %29 = tpu.concatenate %27, %28 in 1 : vector<1x3x16xf32>, vector<1x13x16xf32> -> vector<1x16x16xf32>
    %30 = vector.extract_strided_slice %23 {offsets = [0, 0, 0], sizes = [1, 14, 16], strides = [1, 1, 1]} : vector<1x16x16xf32> to vector<1x14x16xf32>
    %31 = tpu.concatenate %26, %30 in 1 : vector<1x2x16xf32>, vector<1x14x16xf32> -> vector<1x16x16xf32>
    %32 = vector.extract_strided_slice %23 {offsets = [0, 0, 0], sizes = [1, 15, 16], strides = [1, 1, 1]} : vector<1x16x16xf32> to vector<1x15x16xf32>
    %33 = tpu.concatenate %25, %32 in 1 : vector<1x1x16xf32>, vector<1x15x16xf32> -> vector<1x16x16xf32>
    %34 = vector.extract_strided_slice %23 {offsets = [0, 1, 0], sizes = [1, 15, 16], strides = [1, 1, 1]} : vector<1x16x16xf32> to vector<1x15x16xf32>
    %35 = tpu.concatenate %34, %25 in 1 : vector<1x15x16xf32>, vector<1x1x16xf32> -> vector<1x16x16xf32>
    %36 = vector.extract_strided_slice %23 {offsets = [0, 2, 0], sizes = [1, 14, 16], strides = [1, 1, 1]} : vector<1x16x16xf32> to vector<1x14x16xf32>
    %37 = tpu.concatenate %36, %26 in 1 : vector<1x14x16xf32>, vector<1x2x16xf32> -> vector<1x16x16xf32>
    %38 = vector.extract_strided_slice %23 {offsets = [0, 3, 0], sizes = [1, 13, 16], strides = [1, 1, 1]} : vector<1x16x16xf32> to vector<1x13x16xf32>
    %39 = tpu.concatenate %38, %27 in 1 : vector<1x13x16xf32>, vector<1x3x16xf32> -> vector<1x16x16xf32>
    %40 = vector.extract_strided_slice %24 {offsets = [0, 0, 0], sizes = [1, 13, 16], strides = [1, 1, 1]} : vector<1x16x16xf32> to vector<1x13x16xf32>
    %41 = tpu.concatenate %27, %40 in 1 : vector<1x3x16xf32>, vector<1x13x16xf32> -> vector<1x16x16xf32>
    %42 = vector.extract_strided_slice %24 {offsets = [0, 0, 0], sizes = [1, 14, 16], strides = [1, 1, 1]} : vector<1x16x16xf32> to vector<1x14x16xf32>
    %43 = tpu.concatenate %26, %42 in 1 : vector<1x2x16xf32>, vector<1x14x16xf32> -> vector<1x16x16xf32>
    %44 = vector.extract_strided_slice %24 {offsets = [0, 0, 0], sizes = [1, 15, 16], strides = [1, 1, 1]} : vector<1x16x16xf32> to vector<1x15x16xf32>
    %45 = tpu.concatenate %25, %44 in 1 : vector<1x1x16xf32>, vector<1x15x16xf32> -> vector<1x16x16xf32>
    %46 = vector.extract_strided_slice %24 {offsets = [0, 1, 0], sizes = [1, 15, 16], strides = [1, 1, 1]} : vector<1x16x16xf32> to vector<1x15x16xf32>
    %47 = tpu.concatenate %46, %25 in 1 : vector<1x15x16xf32>, vector<1x1x16xf32> -> vector<1x16x16xf32>
    %48 = vector.extract_strided_slice %24 {offsets = [0, 2, 0], sizes = [1, 14, 16], strides = [1, 1, 1]} : vector<1x16x16xf32> to vector<1x14x16xf32>
    %49 = tpu.concatenate %48, %26 in 1 : vector<1x14x16xf32>, vector<1x2x16xf32> -> vector<1x16x16xf32>
    %50 = vector.extract_strided_slice %24 {offsets = [0, 3, 0], sizes = [1, 13, 16], strides = [1, 1, 1]} : vector<1x16x16xf32> to vector<1x13x16xf32>
    %51 = tpu.concatenate %50, %27 in 1 : vector<1x13x16xf32>, vector<1x3x16xf32> -> vector<1x16x16xf32>
    %52 = tpu.concatenate %29, %31, %33, %23, %35, %37, %39, %41, %43, %45, %24, %47, %49, %51 in 2 : vector<1x16x16xf32>, vector<1x16x16xf32>, vector<1x16x16xf32>, vector<1x16x16xf32>, vector<1x16x16xf32>, vector<1x16x16xf32>, vector<1x16x16xf32>, vector<1x16x16xf32>, vector<1x16x16xf32>, vector<1x16x16xf32>, vector<1x16x16xf32>, vector<1x16x16xf32>, vector<1x16x16xf32>, vector<1x16x16xf32> -> vector<1x16x224xf32>
    %53 = arith.truncf %52 : vector<1x16x224xf32> to vector<1x16x224xbf16>
    %54 = vector.shape_cast %53 : vector<1x16x224xbf16> to vector<16x224xbf16>
    %c0_20 = arith.constant 0 : index
    %c0_21 = arith.constant 0 : index
    %55 = vector.load %arg3[%c0_20, %c0_21] : memref<224x16xbf16, #tpu.memory_space<vmem>>, vector<224x16xbf16>
    %cst_22 = arith.constant dense<0.000000e+00> : vector<16x16xf32>
    %56 = tpu.matmul %54, %55, %cst_22 {dimension_numbers = #tpu.dot_dimension_numbers<[1], [0], [0], [1], [0, 0, 1, 1], [], []>} : vector<16x224xbf16>, vector<224x16xbf16>, vector<16x16xf32> -> vector<16x16xf32>
    %57 = arith.negf %56 : vector<16x16xf32>
    %58 = math.exp %57 : vector<16x16xf32>
    %cst_23 = arith.constant 1.000000e+00 : f32
    %59 = vector.broadcast %cst_23 : f32 to vector<16x16xf32>
    %60 = arith.addf %59, %58 : vector<16x16xf32>
    %61 = arith.divf %59, %60 : vector<16x16xf32>
    %62 = vector.shape_cast %61 : vector<16x16xf32> to vector<1x1x16x16xf32>
    %c0_24 = arith.constant 0 : index
    %c0_25 = arith.constant 0 : index
    %c0_26 = arith.constant 0 : index
    %c0_27 = arith.constant 0 : index
    %63 = vector.load %arg4[%c0_24, %c0_25, %c0_26, %c0_27] : memref<1x1x16x16xf32, #tpu.memory_space<vmem>>, vector<1x1x16x16xf32>
    tpu.vector_store %arg4[%c0_24, %c0_25, %c0_26, %c0_27], %62 {strides = array<i32>} : memref<1x1x16x16xf32, #tpu.memory_space<vmem>>, vector<1x1x16x16xf32>,
    return
  }
  func.func @transform_0(%arg0: i32) -> (i32, i32, i32, i32) {
    %c0_i32 = arith.constant 0 : i32
    %c0_i32_0 = arith.constant 0 : i32
    %c0_i32_1 = arith.constant 0 : i32
    %c0_i32_2 = arith.constant 0 : i32
    return %arg0, %c0_i32, %c0_i32_0, %c0_i32_1 : i32, i32, i32, i32
  }
  func.func @transform_1(%arg0: i32) -> (i32, i32, i32, i32) {
    %c0_i32 = arith.constant 0 : i32
    %c0_i32_0 = arith.constant 0 : i32
    %c0_i32_1 = arith.constant 0 : i32
    %c0_i32_2 = arith.constant 0 : i32
    return %arg0, %c0_i32, %c0_i32_0, %c0_i32_1 : i32, i32, i32, i32
  }
  func.func @transform_2(%arg0: i32) -> (i32, i32) {
    %c0_i32 = arith.constant 0 : i32
    %c0_i32_0 = arith.constant 0 : i32
    %c0_i32_1 = arith.constant 0 : i32
    return %c0_i32, %c0_i32_0 : i32, i32
  }
  func.func @transform_3(%arg0: i32) -> (i32, i32, i32, i32) {
    %c0_i32 = arith.constant 0 : i32
    %c0_i32_0 = arith.constant 0 : i32
    %c0_i32_1 = arith.constant 0 : i32
    %c0_i32_2 = arith.constant 0 : i32
    return %arg0, %c0_i32, %c0_i32_0, %c0_i32_1 : i32, i32, i32, i32
  }
}

</mosaic_0001>

<bundles_post_ra>
// kernel: tpu_custom_call.1
= control target key start
LH: loop header
LB: loop body
LE: loop exit
PB: predicated region body
PF: predicated region fallthrough
CT: control target
= control target key end

     0   :  { %8 = vsyncpa [#allocation3], 0  ;;  %s1359_s0 = inlined_call_operand.vmem [shape: f32[2,4,16,16], index: 0, kind: input, shape index: {}]   ;;  %s1360_s1 = inlined_call_operand.hbm [shape: f32[2,1,16,16], index: 1, kind: input, shape index: {}]   ;;  %s1361_s2 = inlined_call_operand.vmem [shape: bf16[224,16], index: 2, kind: input, shape index: {}]   ;;  %s1362_s3 = inlined_call_operand.hbm [shape: f32[2,1,16,16], index: 3, kind: output, shape index: {}]  }
   0x1   :  { %10 = vsyncpa [#allocation3 + $0x1], 0 }
   0x2   :  { %11 = vsyncpa [#allocation4], 0 }
   0x3   :  { %13 = vsyncpa [#allocation4 + $0x1], 0  ;;  %s1033_s12 = smov 0   ;;  %s1035_s13 = smov 0  }
   0x4   :  { %s1037_s14 = smov 0   ;;  %s1039_s15 = smov 0  }
   0x5 LB: > { %s1054_s16 = sadd.s32 4294967295, %s997_s15   ;;  %s709_s17 = sadd.s32 4294967294, %s997_s15   ;;  %s997_s15 = sphi %s1039_s15, %s1375_s15   ;;  %s993_s14 = sphi %s1037_s14, %s1374_s14   ;;  %s989_s13 = sphi %s1035_s13, %s1373_s13   ;;  %s985_s12 = sphi %s1033_s12, %s1372_s12  }
   0x6   : > { %s1058_s18 = sadd.s32 1, %s997_s15   ;;  %s52_s19 = sadd.s32 1, %s993_s14 }
   0x7   : > { %s49_s20 = ssub.s32 %s997_s15, %s1058_s18  ;;  %p59_p0 = scmp.ne.s32.totalorder %s993_s14, %s989_s13 }
   0x8   : > { %p50_p1 = scmp.eq.s32.totalorder %s49_s20, 0  ;;  %p60_p2 = scmp.eq.s32.totalorder %s997_s15, 0 }
   0x9   : > { %p65_p3 = scmp.ne.s32.totalorder %s989_s13, %s985_s12  ;;  %p66_p4 = scmp.eq.s32.totalorder %s1054_s16, 0 }
   0xa   : > { %s1070_s21 = scalar_select %p50_p1, %s993_s14, %s52_s19  }
   0xb   : > { %p1072_p5 = por %p60_p2, %p59_p0  ;;  %p1076_p6 = por %p66_p4, %p65_p3 }
   0xc   : > { %p110_p7 = scmp.eq.s32.totalorder %s1054_s16, 1  ;;  %p116_p8 = scmp.eq.s32.totalorder %s709_s17, 1 }
   0xd   : > { %p765_p10 = scmp.lt.s32.totalorder %s997_s15, 2  ;;  %s147_s26 = sand.u32 1, %s993_s14  }
   0xe   : > { %p1083_p11 = por %p110_p7, %p59_p0  ;;  %p1087_p12 = por %p116_p8, %p65_p3 }
   0xf   : > { %s750_s27 = sshll.u32 %s997_s15, 8  ;;  %s712_s28 = sshll.u32 %s147_s26, 4 }
  0x10   : > { %s1366_s24 = scalar_select %p1083_p11, 1, 0 }
  0x11   : > { %s1367_s25 = scalar_select %p1087_p12, 1, 0 }
  0x12   : > { %s1096_s4 = scalar_lea.hbm %s1360_s1, %s750_s27  ;;  %s151_s5 = scalar_lea.vmem [#allocation2], %s712_s28 }
  0x13   : > { %s158_s6 = sshll.u32 %s151_s5, 4  ;;  %p1100_p13 = pnand %p765_p10, %p1072_p5  ;;  %s1104_s6 = int_to_ptr.vmem [resolvable:$true] %s158_s6 }
  0x14   : > { %s1106_s8 = scalar_lea.sflag [#allocation3], %s147_s26  ;;  %s901_s9 = scalar_lea.hbm %s1096_s4, 256 }
  0x15   : > { %p902_p0 = scmp.ne.s32.totalorder %s1096_s4, %s901_s9  ;;  %p903_p1 = pneg %p1100_p13 }
  0x16   : > { %s906_s17 = scalar_lea.hbm %s1360_s1, 512  ;;  %p907_p4 = scmp.lt.u32.totalorder %s1096_s4, %s1360_s1 }
  0x17   : > { %p904_p2 = pnand %p903_p1, %p902_p0  ;;  %p908_p5 = scmp.lt.u32.totalorder %s906_s17, %s901_s9 }
  0x18   : > { %p910_p8 = scmp.lt.u32.totalorder %s901_s9, %s1096_s4 }
  0x19   : > { %p905_p3 = pneg %p904_p2  ;;  %p909_p7 = por %p908_p5, %p907_p4 }
  0x1b   : > { %p911_p10 = por %p910_p8, %p909_p7 }
  0x1d   : > { %p912_p9 = pnand %p911_p10, %p905_p3 }
  0x1f   : > { %915 = shalt.err (!%p912_p9)
}
  0x20   : > { %s916_s22 = scalar_lea.vmem %s1104_s6, 256  ;;  %s999_s26 = smov [#allocation2]  }
  0x21   : > { %p917_p0 = scmp.ne.s32.totalorder %s1104_s6, %s916_s22  ;;  %s921_s27 = sshll.u32 %s999_s26, 4  ;;  %s922_s27 = int_to_ptr.vmem [resolvable:$false] %s921_s27 }
  0x22   : > { %s923_s28 = scalar_lea.vmem %s922_s27, 512  ;;  %p924_p11 = scmp.lt.s32.totalorder %s1104_s6, %s922_s27 }
  0x23   : > { %p919_p2 = pnand %p917_p0, %p903_p1  ;;  %p925_p4 = scmp.lt.s32.totalorder %s923_s28, %s916_s22 }
  0x25   : > { %p920_p12 = pneg %p919_p2  ;;  %p926_p5 = por %p925_p4, %p924_p11 }
  0x27   : > { %p927_p7 = pnand %p926_p5, %p920_p12 }
  0x29   : > { %930 = shalt.err (!%p927_p7)
}
  0x2a   : > { %s1000_s29 = smov 128   ;;  %s1001_s30 = smov 8  }
  0x2b   : > { %760 = dma.hbm_to_vmem [thread:$0]  (!%p1100_p13), %s1096_s4, 256, %s1104_s6, %s1106_s8, %s1000_s29, %s1000_s29, %s1001_s30  }
  0x2c   : > { %p715_p9 = scmp.ge.s32.totalorder %s997_s15, 1  ;;  %p166_p1 = scmp.lt.s32.totalorder %s997_s15, 3 }
  0x2e   : > { %p167_p3 = pnand %p715_p9, %p166_p1 }
  0x2f   : > { %s1137_s5 = sand.u32 (!%p167_p3), 1, %s989_s13  }
  0x30   : > { %170 = sbr.rel (%p167_p3) target bundleno = 484 (0x1e4), region = 32  ;;  %s716_s9 = sshll.u32 (!%p167_p3), %s1137_s5, 4 }
  0x31   : > { %s173_s10 = scalar_lea.sflag (!%p167_p3), [#allocation3], %s1137_s5  ;;  %s176_s11 = scalar_lea.vmem (!%p167_p3), [#allocation2], %s716_s9 }
  0x37   : > { %976 = dma.done.wait (%p1076_p6), %s173_s10, 256  }
  0x38   : > { %978 = vsyncadd (%p1076_p6), %s173_s10, 4294967040  ;;  %p204_p11 = scmp.lt.s32.totalorder %s1054_s16, 1  ;;  %v1002_v0 = vmov 0   ;;  %v235_v1 = vld [vmem:[%s176_s11] sm:$0xff]  ;;  %v236_v2 = vld [vmem:[%s176_s11 + $0x8] sm:$0xff]  ;;  %vm268_vm0 = vcmask 1040384  }
  0x39   : > { %555 = vmatprep.subr.bf16.mxu0 %v1002_v0  ;;  %v726_v3 = vmul.f32 -1.442695, %v235_v1  ;;  %v871_v4 = vld [vmem:[%s1361_s2] sm:$0xff]   ;;  %v727_v5 = vmul.f32 -1.442695, %v236_v2  ;;  %v872_v6 = vld [vmem:[%s1361_s2 + $0x8] sm:$0xff]  }
  0x3a   : > { %s205_s4 = scalar_select %p204_p11, %s1054_s16, 1  ;;  %556 = vmatpush1.bf16.msra.mxu0 %v871_v4  ;;  %v873_v10 = vld [vmem:[%s1361_s2 + $0x10] sm:$0xff]   ;;  %v874_v12 = vld [vmem:[%s1361_s2 + $0x18] sm:$0xff]   ;;  %v875_v23 = vld [vmem:[%s1361_s2 + $0x20] sm:$0xff]   ;;  %vm262_vm1 = vcmask 1041408   ;;  %vm274_vm2 = vcmask 1046528  }
  0x3b   : > { %885 = vpow2.f32 %v726_v3  ;;  %557 = vmatprep.subr.bf16.mxu0 %v1002_v0  ;;  %v876_v30 = vld [vmem:[%s1361_s2 + $0x28] sm:$0xff]   ;;  %v877_v35 = vld [vmem:[%s1361_s2 + $0x30] sm:$0xff]   ;;  %v878_v42 = vld [vmem:[%s1361_s2 + $0x38] sm:$0xff]   ;;  %vm280_vm3 = vcmask 1045504   ;;  %vm286_vm4 = vcmask 1044480   ;;  %s1003_s20 = smov 32  }
  0x3c   : > { %s751_s6 = sshll.u32 %s205_s4, 6  ;;  %887 = vpow2.f32 %v727_v5  ;;  %v879_v57 = vld [vmem:[%s1361_s2 + $0x40] sm:$0xff]   ;;  %s1004_s22 = smov 48   ;;  %vm255_vm5 = vcmask 1042432   ;;  %vm407_vm6 = vcmask 130048   ;;  %vm410_vm7 = vcmask 261120  }
  0x3d   : > { %s1156_s23 = scalar_lea.vmem %s1359_s0, %s751_s6  ;;  %s1005_s28 = smov 16   ;;  %vm413_vm8 = vcmask 392192   ;;  %vm416_vm9 = vcmask 523264   ;;  %vm419_vm10 = vcmask 654336   ;;  %vm422_vm11 = vcmask 785408  }
  0x3e   : > { %v210_v7 = vld [vmem:[%s1156_s23] sm:$0xff]  ;;  %v720_v8 = vld [vmem:[%s1156_s23 + $0x10] sm:$0xff]  ;;  %v211_v9 = vld [vmem:[%s1156_s23 + $0x8] sm:$0xff]  ;;  %558 = vmatpush1.bf16.msra.mxu0 %v872_v6  ;;  %s1006_s10 = smov 64   ;;  %s1007_s6 = smov 80   ;;  %vm425_vm12 = vcmask 916480  }
  0x3f   : > { %v721_v11 = vld [vmem:[%s1156_s23 + $0x18] sm:$0xff]  ;;  %559 = vmatprep.subr.bf16.mxu0 %v1002_v0  ;;  %v722_v13 = vld [vmem:[%s1156_s23 + $0x20] sm:$0xff]  ;;  %v215_v14 = vadd.f32 %v720_v8, %v210_v7  ;;  %v723_v17 = vld [vmem:[%s1156_s23 + $0x28] sm:$0xff]  ;;  %v217_v20 = vmax.f32 %v210_v7, %v720_v8  ;;  %s1008_s17 = smov 96   ;;  %s203_s26 = scalar_lea.vmem [#allocation5], %s716_s9 }
  0x40   : > { %v216_v15 = vadd.f32 %v721_v11, %v211_v9  ;;  %v218_v24 = vmax.f32 %v211_v9, %v721_v11  ;;  %v724_v25 = vld [vmem:[%s1156_s23 + $0x30] sm:$0xff]  ;;  %v725_v27 = vld [vmem:[%s1156_s23 + $0x38] sm:$0xff]  ;;  %v880_v11 = vld [vmem:[%s1361_s2 + $0x48] sm:$0xff]   ;;  %s624_s27 = sshll.u32 %s203_s26, 4  ;;  %p1369_p12 = scmp.ne.s32.totalorder %s1366_s24, 0  ;;  %s1313_s27 = int_to_ptr.vmem [resolvable:$true] %s624_s27 }
  0x41   : > { %v222_v22 = vadd.f32 %v722_v13, %v215_v14  ;;  %v224_v28 = vmax.f32 %v217_v20, %v722_v13  ;;  %s1010_s9 = smov [#allocation5]  }
  0x42   : > { %560 = vmatpush1.bf16.msra.mxu0 %v873_v10  ;;  %v223_v26 = vadd.f32 %v723_v17, %v216_v15  ;;  %v225_v31 = vmax.f32 %v218_v24, %v723_v17  ;;  %v881_v24 = vld [vmem:[%s1361_s2 + $0x50] sm:$0xff]   ;;  %s935_s11 = sshll.u32 %s1010_s9, 4  ;;  %s936_s11 = int_to_ptr.vmem [resolvable:$false] %s935_s11 }
  0x43   : > { %561 = vmatprep.subr.bf16.mxu0 %v1002_v0  ;;  %v229_v29 = vadd.f32 %v724_v25, %v222_v22  ;;  %v231_v33 = vmax.f32 %v224_v28, %v724_v25  ;;  %s937_s4 = scalar_lea.vmem %s936_s11, 512  ;;  %p938_p10 = scmp.lt.s32.totalorder %s1313_s27, %s936_s11 }
  0x44   : > { %v230_v32 = vadd.f32 %v725_v27, %v223_v26  ;;  %v232_v36 = vmax.f32 %v225_v31, %v725_v27 }
  0x45   : > { %v886_v16 = vpop.eup %885  ;;  %v233_v34 = vmul.f32 0.25, %v229_v29 }
  0x46   : > { %v888_v18 = vpop.eup %887  ;;  %v243_v19 = vadd.f32 1.0, %v886_v16  ;;  %562 = vmatpush1.bf16.msra.mxu0 %v874_v12  ;;  %v234_v37 = vmul.f32 0.25, %v230_v32 }
  0x47   : > { %v244_v21 = vadd.f32 1.0, %v888_v18  ;;  %563 = vmatprep.subr.bf16.mxu0 %v1002_v0 }
  0x48   : > { %889 = vrcp.f32 %v243_v19 }
  0x49   : > { %891 = vrcp.f32 %v244_v21 }
  0x4a   : > { %564 = vmatpush1.bf16.msra.mxu0 %v875_v23 }
  0x4b   : > { %565 = vmatprep.subr.bf16.mxu0 %v1002_v0 }
  0x4e   : > { %566 = vmatpush1.bf16.msra.mxu0 %v876_v30 }
  0x4f   : > { %567 = vmatprep.subr.bf16.mxu0 %v1002_v0 }
  0x52   : > { %v890_v38 = vpop.eup %889  ;;  %568 = vmatpush1.bf16.msra.mxu0 %v877_v35 }
  0x53   : > { %v892_v39 = vpop.eup %891  ;;  %v1190_v40 = vmul.f32 %v890_v38, %v231_v33  ;;  %v1192_v41 = vmul.f32 %v890_v38, %v233_v34  ;;  %569 = vmatprep.subr.bf16.mxu0 %v1002_v0 }
  0x54   : > { %v1197_v43 = vmul.f32 %v892_v39, %v232_v36  ;;  %v1199_v44 = vmul.f32 %v892_v39, %v234_v37  ;;  %v882_v37 = vld [vmem:[%s1361_s2 + $0x58] sm:$0xff]  }
  0x55   : > { %v305_v45 = vrot.slane %v1190_v40, 7  ;;  %v263_v46 = vrot.slane %v1192_v41, 6  ;;  %v275_v47 = vrot.slane %v1192_v41, 1  ;;  %v269_v48 = vrot.slane %v1192_v41, 7 }
  0x56   : > { %v816_v49 = vpack.i.bf16 %v1197_v43, %v1190_v40  ;;  %v811_v50 = vpack.i.bf16 %v1199_v44, %v1192_v41  ;;  %v306_v51 = vrot.slane %v1197_v43, 7  ;;  %v264_v52 = vrot.slane %v1199_v44, 6  ;;  %570 = vmatpush1.bf16.msra.mxu0 %v878_v42 }
  0x57   : > { %v309_v53 = vsel %vm268_vm0, 0.0, %v305_v45  ;;  %v267_v54 = vsel %vm262_vm1, 0.0, %v263_v46  ;;  %v276_v55 = vrot.slane %v1199_v44, 1  ;;  %v270_v56 = vrot.slane %v1199_v44, 7  ;;  %571 = vmatprep.subr.bf16.mxu0 %v1002_v0 }
  0x58   : > { %817 = vrot.lane.b32.xlu0 %v816_v49, %s1003_s20  ;;  %812 = vrot.lane.b32.xlu1 %v811_v50, %s1004_s22  ;;  %v307_v58 = vsel %vm268_vm0, %v305_v45, %v306_v51  ;;  %v265_v59 = vsel %vm262_vm1, %v263_v46, %v264_v52  ;;  %v273_v60 = vsel %vm268_vm0, 0.0, %v269_v48  ;;  %v281_v61 = vrot.slane %v1192_v41, 2 }
  0x59   : > { %v831_v62 = vpack.i.bf16 %v307_v58, %v309_v53  ;;  %v821_v63 = vpack.i.bf16 %v265_v59, %v267_v54  ;;  %v277_v1 = vsel %vm274_vm2, %v275_v47, %v276_v55  ;;  %v279_v2 = vsel %vm274_vm2, %v276_v55, 0.0  ;;  %v884_v47 = vld [vmem:[%s1361_s2 + $0x68] sm:$0xff]  }
  0x5a   : > { %v836_v3 = vpack.i.bf16 %v279_v2, %v277_v1  ;;  %v271_v4 = vsel %vm268_vm0, %v269_v48, %v270_v56  ;;  %v282_v5 = vrot.slane %v1199_v44, 2  ;;  %v310_v6 = vrot.slane %v1190_v40, 1  ;;  %572 = vmatpush1.bf16.msra.mxu0 %v879_v57 }
  0x5b   : > { %v826_v7 = vpack.i.bf16 %v271_v4, %v273_v60  ;;  %v311_v8 = vrot.slane %v1197_v43, 1  ;;  %v287_v9 = vrot.slane %v1192_v41, 3  ;;  %v288_v10 = vrot.slane %v1199_v44, 3  ;;  %573 = vmatprep.subr.bf16.mxu0 %v1002_v0 }
  0x5c   : > { %832 = vrot.lane.b32.xlu1 %v831_v62, %s1005_s28  ;;  %822 = vrot.lane.b32.xlu0 %v821_v63, %s1005_s28  ;;  %v283_v12 = vsel %vm280_vm3, %v281_v61, %v282_v5  ;;  %v285_v13 = vsel %vm280_vm3, %v282_v5, 0.0  ;;  %v315_v14 = vrot.slane %v1190_v40, 2  ;;  %v316_v15 = vrot.slane %v1197_v43, 2 }
  0x5d   : > { %v312_v16 = vsel %vm274_vm2, %v310_v6, %v311_v8  ;;  %v314_v17 = vsel %vm274_vm2, %v311_v8, 0.0  ;;  %v846_v18 = vpack.i.bf16 %v285_v13, %v283_v12  ;;  %v289_v19 = vsel %vm286_vm4, %v287_v9, %v288_v10 }
  0x5e   : > { %v841_v20 = vpack.i.bf16 %v314_v17, %v312_v16  ;;  %v291_v21 = vsel %vm286_vm4, %v288_v10, 0.0  ;;  %v317_v22 = vsel %vm280_vm3, %v315_v14, %v316_v15  ;;  %v319_v23 = vsel %vm280_vm3, %v316_v15, 0.0  ;;  %574 = vmatpush1.bf16.msra.mxu0 %v880_v11 }
  0x5f   : > { %v294_v25 = vrot.slane %v1190_v40, 5  ;;  %v295_v26 = vrot.slane %v1197_v43, 5  ;;  %v299_v27 = vrot.slane %v1190_v40, 6  ;;  %v300_v28 = vrot.slane %v1197_v43, 6  ;;  %575 = vmatprep.subr.bf16.mxu0 %v1002_v0 }
  0x60   : > { %837 = vrot.lane.b32.xlu1 %v836_v3, %s1006_s10  ;;  %827 = vrot.lane.b32.xlu0 %v826_v7, %s1003_s20  ;;  %v320_v29 = vrot.slane %v1190_v40, 3  ;;  %v321_v30 = vrot.slane %v1197_v43, 3  ;;  %v257_v31 = vrot.slane %v1199_v44, 5  ;;  %v256_v32 = vrot.slane %v1192_v41, 5  ;;  %v883_v44 = vld [vmem:[%s1361_s2 + $0x60] sm:$0xff]   ;;  %s1009_s20 = smov 112  }
  0x61   : > { %v301_v33 = vsel %vm262_vm1, %v299_v27, %v300_v28  ;;  %v304_v34 = vsel %vm262_vm1, 0.0, %v299_v27  ;;  %v856_v38 = vpack.i.bf16 %v291_v21, %v289_v19  ;;  %v851_v39 = vpack.i.bf16 %v319_v23, %v317_v22 }
  0x62   : > { %v258_v35 = vsel %vm255_vm5, %v256_v32, %v257_v31  ;;  %v261_v36 = vsel %vm255_vm5, 0.0, %v256_v32  ;;  %576 = vmatpush1.bf16.msra.mxu0 %v881_v24  ;;  %v296_v40 = vsel %vm255_vm5, %v294_v25, %v295_v26  ;;  %v298_v41 = vsel %vm255_vm5, 0.0, %v294_v25 }
  0x63   : > { %v322_v42 = vsel %vm286_vm4, %v320_v29, %v321_v30  ;;  %v324_v43 = vsel %vm286_vm4, %v321_v30, 0.0  ;;  %577 = vmatprep.subr.bf16.mxu0 %v1002_v0  ;;  %v866_v45 = vpack.i.bf16 %v296_v40, %v298_v41 }
  0x64   : > { %847 = vrot.lane.b32.xlu1 %v846_v18, %s1007_s6  ;;  %842 = vrot.lane.b32.xlu0 %v841_v20, %s1004_s22  ;;  %v861_v46 = vpack.i.bf16 %v324_v43, %v322_v42  ;;  %s752_s22 = sshll.u32 %s1054_s16, 8  ;;  %s611_s16 = scalar_lea.sflag [#allocation4], %s1137_s5 }
  0x65   : > { %s1311_s30 = scalar_lea.hbm %s1362_s3, %s752_s22 }
  0x66   : > { %578 = vmatpush1.bf16.msra.mxu0 %v882_v37 }
  0x67   : > { %579 = vmatprep.subr.bf16.mxu0 %v1002_v0 }
  0x68   : > { %857 = vrot.lane.b32.xlu1 %v856_v38, %s1008_s17  ;;  %852 = vrot.lane.b32.xlu0 %v851_v39, %s1006_s10  ;;  %s931_s10 = scalar_lea.vmem %s1313_s27, 256 }
  0x69   : > { %p932_p6 = scmp.ne.s32.totalorder %s1313_s27, %s931_s10  ;;  %p939_p0 = scmp.lt.s32.totalorder %s937_s4, %s931_s10 }
  0x6a   : > { %580 = vmatpush1.bf16.msra.mxu0 %v883_v44 }
  0x6b   : > { %581 = vmatprep.subr.bf16.mxu0 %v1002_v0  ;;  %p933_p13 = pnand %p932_p6, %p1369_p12  ;;  %p940_p2 = por %p939_p0, %p938_p10 }
  0x6c   : > { %867 = vrot.lane.b32.xlu1 %v866_v45, %s1009_s20  ;;  %862 = vrot.lane.b32.xlu0 %v861_v46, %s1007_s6 }
  0x6d   : > { %p934_p8 = pneg %p933_p13 }
  0x6e   : > { %582 = vmatpush1.bf16.msra.mxu0 %v884_v47 }
  0x6f   : > { %p941_p4 = pnand %p940_p2, %p934_p8 }
  0xca   : > { %v818_v48 = vpop.permute.xlu0 %817  ;;  %v813_v49 = vpop.permute.xlu1 %812 }
  0xcb   : > { %v815_v63 = vunpack.i.h.bf16 %v813_v49  ;;  %v814_v1 = vunpack.i.l.bf16 %v813_v49  ;;  %v820_v16 = vunpack.i.h.bf16 %v818_v48  ;;  %v819_v17 = vunpack.i.l.bf16 %v818_v48 }
  0xce   : > { %v833_v50 = vpop.permute.xlu1 %832  ;;  %v823_v51 = vpop.permute.xlu0 %822 }
  0xcf   : > { %v825_v52 = vunpack.i.h.bf16 %v823_v51  ;;  %v824_v53 = vunpack.i.l.bf16 %v823_v51  ;;  %v835_v60 = vunpack.i.h.bf16 %v833_v50  ;;  %v834_v0 = vunpack.i.l.bf16 %v833_v50 }
  0xd1   : > { %v408_v58 = vsel %vm407_vm6, %v261_v36, %v824_v53  ;;  %v409_v59 = vsel %vm407_vm6, %v258_v35, %v825_v52  ;;  %v429_v8 = vsel %vm407_vm6, %v301_v33, %v835_v60  ;;  %v428_v9 = vsel %vm407_vm6, %v304_v34, %v834_v0 }
  0xd2   : > { %v838_v54 = vpop.permute.xlu1 %837  ;;  %v828_v55 = vpop.permute.xlu0 %827  ;;  %v430_v24 = vsel %vm410_vm7, %v428_v9, %v819_v17  ;;  %v431_v25 = vsel %vm410_vm7, %v429_v8, %v820_v16 }
  0xd3   : > { %v830_v56 = vunpack.i.h.bf16 %v828_v55  ;;  %v829_v57 = vunpack.i.l.bf16 %v828_v55  ;;  %v840_v4 = vunpack.i.h.bf16 %v838_v54  ;;  %v839_v5 = vunpack.i.l.bf16 %v838_v54 }
  0xd5   : > { %v411_v61 = vsel %vm410_vm7, %v408_v58, %v829_v57  ;;  %v412_v62 = vsel %vm410_vm7, %v409_v59, %v830_v56 }
  0xd6   : > { %v848_v2 = vpop.permute.xlu1 %847  ;;  %v843_v3 = vpop.permute.xlu0 %842  ;;  %v414_v6 = vsel %vm413_vm8, %v411_v61, %v814_v1  ;;  %v415_v7 = vsel %vm413_vm8, %v412_v62, %v815_v63 }
  0xd7   : > { %v850_v10 = vunpack.i.h.bf16 %v848_v2  ;;  %v849_v11 = vunpack.i.l.bf16 %v848_v2  ;;  %v845_v12 = vunpack.i.h.bf16 %v843_v3  ;;  %v844_v13 = vunpack.i.l.bf16 %v843_v3 }
  0xd8   : > { %v417_v18 = vsel %vm416_vm9, %v414_v6, %v839_v5  ;;  %v418_v19 = vsel %vm416_vm9, %v415_v7, %v840_v4 }
  0xd9   : > { %v433_v26 = vsel %vm413_vm8, %v431_v25, %v845_v12  ;;  %v432_v27 = vsel %vm413_vm8, %v430_v24, %v844_v13  ;;  %v420_v30 = vsel %vm419_vm10, %v417_v18, %v849_v11  ;;  %v421_v31 = vsel %vm419_vm10, %v418_v19, %v850_v10 }
  0xda   : > { %v858_v14 = vpop.permute.xlu1 %857  ;;  %v853_v15 = vpop.permute.xlu0 %852 }
  0xdb   : > { %v860_v20 = vunpack.i.h.bf16 %v858_v14  ;;  %v859_v21 = vunpack.i.l.bf16 %v858_v14  ;;  %v855_v22 = vunpack.i.h.bf16 %v853_v15  ;;  %v854_v23 = vunpack.i.l.bf16 %v853_v15 }
  0xdd   : > { %v423_v36 = vsel %vm422_vm11, %v420_v30, %v859_v21  ;;  %v424_v37 = vsel %vm422_vm11, %v421_v31, %v860_v20  ;;  %v434_v38 = vsel %vm416_vm9, %v432_v27, %v854_v23  ;;  %v435_v39 = vsel %vm416_vm9, %v433_v26, %v855_v22 }
  0xde   : > { %v868_v28 = vpop.permute.xlu1 %867  ;;  %v863_v29 = vpop.permute.xlu0 %862 }
  0xdf   : > { %v870_v32 = vunpack.i.h.bf16 %v868_v28  ;;  %v869_v33 = vunpack.i.l.bf16 %v868_v28  ;;  %v865_v34 = vunpack.i.h.bf16 %v863_v29  ;;  %v864_v35 = vunpack.i.l.bf16 %v863_v29 }
  0xe1   : > { %v436_v40 = vsel %vm419_vm10, %v434_v38, %v864_v35  ;;  %v437_v41 = vsel %vm419_vm10, %v435_v39, %v865_v34  ;;  %v426_v42 = vsel %vm425_vm12, %v423_v36, %v869_v33  ;;  %v427_v43 = vsel %vm425_vm12, %v424_v37, %v870_v32 }
  0xe2   : > { %v439_v44 = vpack.c.bf16 %v437_v41, %v436_v40  ;;  %v438_v45 = vpack.c.bf16 %v427_v43, %v426_v42 }
  0xe4   : > { %742 = vmatprep.mubr.msk.bf16.mxu0 %vm422_vm11, %v439_v44 }
  0xe5   : > { %588 = vmatmul.mubr.bf16.vlgmr.msra.gmra.mrb[0].mxu0 %v438_v45 }
 0x1b8   : > { %v589_v46 = vpop.f32.mrb[0].mxu0 }
 0x1b9   : > { %v743_v47 = vmul.f32 -1.442695, %v589_v46  ;;  %v591_v48 = vpop.f32.mrb[1].mxu0 }
 0x1ba   : > { %v592_v49 = vpop.f32.mrb[2].mxu0 }
 0x1bb   : > { %893 = vpow2.f32 %v743_v47  ;;  %v744_v50 = vmul.f32 -1.442695, %v592_v49  ;;  %v594_v51 = vpop.f32.mrb[3].mxu0 }
 0x1bd   : > { %895 = vpow2.f32 %v744_v50 }
 0x1c5   : > { %v894_v52 = vpop.eup %893 }
 0x1c6   : > { %v602_v53 = vadd.f32 1.0, %v894_v52 }
 0x1c7   : > { %v896_v54 = vpop.eup %895 }
 0x1c8   : > { %897 = vrcp.f32 %v602_v53  ;;  %v603_v55 = vadd.f32 1.0, %v896_v54 }
 0x1ca   : > { %899 = vrcp.f32 %v603_v55 }
 0x1d2   : > { %v898_v56 = vpop.eup %897 }
 0x1d3   : > { %608 = vst.msk [vmem:[%s203_s26] sm:$0xff] %vm407_vm6, %v898_v56 }
 0x1d4   : > { %v900_v57 = vpop.eup %899 }
 0x1d5   : > { %609 = vst.msk [vmem:[%s203_s26 + $0x8] sm:$0xff] %vm407_vm6, %v900_v57 }
 0x1d6   : > { %944 = shalt.err (!%p941_p4)
}
 0x1d7   : > { %s945_s6 = scalar_lea.hbm %s1311_s30, 256  ;;  %s949_s17 = scalar_lea.hbm %s1362_s3, 512 }
 0x1d8   : > { %p946_p5 = scmp.ne.s32.totalorder %s1311_s30, %s945_s6  ;;  %p950_p1 = scmp.lt.u32.totalorder %s1311_s30, %s1362_s3 }
 0x1d9   : > { %p951_p3 = scmp.lt.u32.totalorder %s949_s17, %s945_s6  ;;  %p953_p6 = scmp.lt.u32.totalorder %s945_s6, %s1311_s30 }
 0x1da   : > { %p947_p7 = pnand %p946_p5, %p1369_p12 }
 0x1db   : > { %p952_p11 = por %p951_p3, %p950_p1 }
 0x1dc   : > { %p948_p9 = pneg %p947_p7 }
 0x1dd   : > { %p954_p13 = por %p953_p6, %p952_p11 }
 0x1df   : > { %p955_p8 = pnand %p954_p13, %p948_p9 }
 0x1e1   : > { %958 = shalt.err (!%p955_p8)
}
 0x1e2   : > { %s1011_s20 = smov 128   ;;  %s1012_s22 = smov 8  }
 0x1e3   : > { %755 = dma.vmem_to_hbm [thread:$0]  (%p1369_p12), %s1313_s27, 256, %s1311_s30, %s611_s16, %s1011_s20, %s1011_s20, %s1012_s22  }
 0x1e4 PF: > { %s639_s26 = sand.u32 1, %s985_s12   ;;  %p1370_p10 = scmp.ne.s32.totalorder %s1367_s25, 0 }
 0x1e5   : > { %p1371_p0 = scmp.ge.s32.totalorder %s997_s15, 2  ;;  %s640_s28 = scalar_lea.sflag [#allocation4], %s639_s26 }
 0x1e7   : > { %p762_p2 = pnand %p1371_p0, %p1370_p10 }
 0x1e9   : > { %980 = dma.done.wait (!%p762_p2), %s640_s28, 256  }
 0x1ea   : > { %982 = vsyncadd (!%p762_p2), %s640_s28, 4294967040  ;;  %p16_p4 = scmp.ge.s32.totalorder %s1058_s18, 4   ;;  %s1372_s12 = smov %s989_s13 }
 0x1eb   : > { %s1373_s13 = smov %s993_s14  ;;  %s1374_s14 = smov %s1070_s21 }
 0x1ec   : > { %s1375_s15 = smov %s1058_s18  ;;  %18 = sbr.rel (!%p16_p4) target bundleno = 5 (0x5), region = 83 }
 0x1f3   :  { %645 = vsyncpa [#allocation3], 1 }
 0x1f4   :  { %647 = vsyncpa [#allocation3 + $0x1], 1 }
 0x1f5   :  { %648 = vsyncpa [#allocation4], 1 }
 0x1f6   :  { %650 = vsyncpa [#allocation4 + $0x1], 1 }

</bundles_post_ra>
